<compile_context>
chip_gen: v7x
topology: tpu7x:2x2x1
jax: 0.10.0
libtpu: 0.0.40
codegen_flags: <defaults>
</compile_context>

<pallas_src>
import functools

import jax
import jax.numpy as jnp
from jax import lax
from jax.experimental import pallas as pl
from jax.experimental.pallas import tpu as pltpu


# --------------------------------------------------------------------------
# helpers
# --------------------------------------------------------------------------
def _round_up(n, m):
    return ((n + m - 1) // m) * m


def _vmem_capacity_bytes():
    try:
        info = pltpu.get_tpu_info()
        for attr in ("vmem_capacity_bytes", "vmem_bytes", "vmem_size_bytes"):
            v = getattr(info, attr, None)
            if v:
                return int(v)
    except Exception:
        pass
    return 128 * 1024 * 1024


def _divisors(n):
    return [d for d in range(1, n + 1) if n % d == 0]


def _pick_row_tile(rows, target):
    cands = [d for d in _divisors(rows) if d <= target and (d % 8 == 0 or d == rows)]
    return max(cands) if cands else rows


def _attn_step_bytes(tH, H, W, C, Cqp):
    """Rough per-grid-step VMEM footprint of the attention pass (bytes)."""
    bf, f32 = 2, 4
    rows_t, rows_f = tH * W, H * W
    io = 2 * 2 * rows_t * C * bf                          # x tile + out tile (dbl-buf)
    resident = 2 * rows_f * (Cqp + C) * bf                # full-image k + v (dbl-buf)
    trans = rows_f * (Cqp + C) * bf                       # kT + vT copies
    qq = 2 * rows_t * Cqp * bf                            # q + qT
    scores = (W * tH * H + tH * W * W) * (2 * f32 + bf)   # eng + exp + att per branch
    outs = W * tH * C * (f32 + bf) + tH * W * C * f32     # out_H, out_Ht, out_W
    return io + resident + trans + qq + scores + outs


def _pick_tile_h(H, W, C, Cqp, budget):
    cands = [d for d in _divisors(H) if (d * W) % 8 == 0 or d == H]
    if not cands:
        return H
    for d in sorted(cands, reverse=True):
        if _attn_step_bytes(d, H, W, C, Cqp) <= budget:
            return d
    return min(cands)


# --------------------------------------------------------------------------
# pass 1: fused key/value 1x1 projection (row-tiled, bf16 out)
# --------------------------------------------------------------------------
def _kv_proj_kernel(x_ref, w_ref, b_ref, k_ref, v_ref, *, Cqp):
    xb = x_ref[0]                                                    # (tR, C) bf16
    kv = jnp.dot(xb, w_ref[...],
                 preferred_element_type=jnp.float32) + b_ref[...]    # (tR, Cqp+C) f32
    k_ref[0] = kv[:, :Cqp].astype(k_ref.dtype)                       # lane-aligned slices
    v_ref[0] = kv[:, Cqp:].astype(v_ref.dtype)


# --------------------------------------------------------------------------
# pass 2: criss-cross attention over an H-tile of query rows
# --------------------------------------------------------------------------
def _cca_attn_kernel(gamma_ref, x_ref, wq_ref, bq_ref, k_ref, v_ref, o_ref,
                     *, H, W, C, Cqp, R):
    t = pl.program_id(1)
    row_off = pl.multiple_of(t * (R * W), R * W)   # first pixel-row of this tile
    h0 = t * R                                      # first image row of this tile

    x_t = x_ref[0]                                  # (R*W, C) bf16
    # ---- query projection for this tile (bf16 MXU, f32 accumulation) ----
    q = (jnp.dot(x_t, wq_ref[...], preferred_element_type=jnp.float32)
         + bq_ref[...]).astype(jnp.bfloat16).reshape(R, W, Cqp)

    # ---- resident full-image key/value (bf16) + this tile's rows --------
    k_img = k_ref[0].reshape(H, W, Cqp)
    v_img = v_ref[0].reshape(H, W, C)
    k_row = k_ref[0, pl.ds(row_off, R * W), :].reshape(R, W, Cqp)
    v_row = v_ref[0, pl.ds(row_off, R * W), :].reshape(R, W, C)

    # ---- column (H) branch: batch-leading dots over W --------------------
    qT = jnp.transpose(q, (1, 0, 2))                # (W, R, Cqp)
    kT = jnp.transpose(k_img, (1, 0, 2))            # (W, H, Cqp)
    vT = jnp.transpose(v_img, (1, 0, 2))            # (W, H, C)

    dn_e = (((2,), (2,)), ((0,), (0,)))
    eng_H = lax.dot_general(qT, kT, dn_e,
                            preferred_element_type=jnp.float32)      # (W, R, H)
    eng_W = lax.dot_general(q, k_row, dn_e,
                            preferred_element_type=jnp.float32)      # (R, W, W)

    # self (g == h) mask on the column branch: one 2-D iota compare,
    # broadcast over W; large finite negative so exp underflows to 0.
    NEG = jnp.float32(-1e30)
    ri = lax.broadcasted_iota(jnp.int32, (R, H), 0) + h0
    gi = lax.broadcasted_iota(jnp.int32, (R, H), 1)
    eng_H = jnp.where((ri == gi)[None, :, :], NEG, eng_H)

    # ---- joint softmax over the H + W candidates (no concat / slice) ----
    mH = jnp.max(eng_H, axis=-1)                    # (W, R)
    mW = jnp.max(eng_W, axis=-1)                    # (R, W)
    m_wr = jnp.maximum(mH, mW.T)                    # (W, R)
    m_rw = m_wr.T                                   # (R, W)
    eH = jnp.exp(eng_H - m_wr[:, :, None])          # (W, R, H)
    eW = jnp.exp(eng_W - m_rw[:, :, None])          # (R, W, W)
    denom = jnp.sum(eH, axis=-1).T + jnp.sum(eW, axis=-1)             # (R, W)
    inv_rw = pl.reciprocal(denom, approx=True)      # EUP
    inv_wr = inv_rw.T
    att_H = (eH * inv_wr[:, :, None]).astype(jnp.bfloat16)            # (W, R, H)
    att_W = (eW * inv_rw[:, :, None]).astype(jnp.bfloat16)            # (R, W, W)

    # ---- aggregate values (batch-leading dots) ---------------------------
    dn_v = (((2,), (1,)), ((0,), (0,)))
    out_H = lax.dot_general(att_H, vT, dn_v,
                            preferred_element_type=jnp.float32)       # (W, R, C)
    out_W = lax.dot_general(att_W, v_row, dn_v,
                            preferred_element_type=jnp.float32)       # (R, W, C)
    # cast BEFORE the C-wide transpose back to row-major (halves XLU bytes)
    out_Ht = jnp.transpose(out_H.astype(jnp.bfloat16), (1, 0, 2))      # (R, W, C)

    gamma = gamma_ref[0, 0]
    attn = gamma * (out_Ht.astype(jnp.float32) + out_W)                # (R, W, C) f32
    o_ref[0] = (attn.reshape(R * W, C) + x_t).astype(o_ref.dtype)


# --------------------------------------------------------------------------
# wrapper
# --------------------------------------------------------------------------
def criss_cross_attention(x_nchw, wq, bq, wk, bk, wv, bv, gamma,
                          *, tile_h=None, row_tile=None):
    """x_nchw: (B, C, H, W) f32. wq/wk: (C//8, C), wv: (C, C) (squeezed 1x1
    conv weights), bq/bk: (C//8,), bv: (C,), gamma: (1,). Returns NCHW f32."""
    B, C, H, W = x_nchw.shape
    Cq = wq.shape[0]
    Cqp = _round_up(Cq, 128)                        # lane-aligned q/k width

    vmem_cap = _vmem_capacity_bytes()
    vmem_limit = min(int(vmem_cap * 0.75), 100 * 1024 * 1024)

    # NHWC, lane-dense (B, H*W, C), bf16 at the kernel boundary.
    # TODO(synk): accept NHWC/bf16 directly to avoid this extra HBM pass.
    x = jnp.transpose(x_nchw, (0, 2, 3, 1)).reshape(B, H * W, C).astype(jnp.bfloat16)

    # Zero-padded / fused projection weights (bf16) and biases (f32).
    def _pad_qk(w, b):
        wt = jnp.zeros((C, Cqp), jnp.float32).at[:, :Cq].set(w.T)
        bt = jnp.zeros((1, Cqp), jnp.float32).at[0, :Cq].set(b)
        return wt, bt

    wq_p, bq_p = _pad_qk(wq, bq)
    wk_p, bk_p = _pad_qk(wk, bk)
    w_kv = jnp.concatenate([wk_p, wv.T.astype(jnp.float32)], axis=1).astype(jnp.bfloat16)
    b_kv = jnp.concatenate([bk_p, bv.reshape(1, C).astype(jnp.float32)], axis=1)
    w_q = wq_p.astype(jnp.bfloat16)
    b_q = bq_p

    rows = H * W

    # ---------------- pass 1: fused key / value projection ----------------
    tR = row_tile or _pick_row_tile(rows, target=4096)
    assert rows % tR == 0 and (tR % 8 == 0 or tR == rows), (tR, rows)

    k_arr, v_arr = pl.pallas_call(
        functools.partial(_kv_proj_kernel, Cqp=Cqp),
        out_shape=(jax.ShapeDtypeStruct((B, rows, Cqp), jnp.bfloat16),
                   jax.ShapeDtypeStruct((B, rows, C), jnp.bfloat16)),
        grid_spec=pltpu.PrefetchScalarGridSpec(
            num_scalar_prefetch=0,
            grid=(B, rows // tR),
            in_specs=[
                pl.BlockSpec((1, tR, C), lambda b, r: (b, r, 0)),        # x tile
                pl.BlockSpec((C, Cqp + C), lambda b, r: (0, 0)),         # fused W^T
                pl.BlockSpec((1, Cqp + C), lambda b, r: (0, 0)),         # fused bias
            ],
            out_specs=[
                pl.BlockSpec((1, tR, Cqp), lambda b, r: (b, r, 0)),      # k
                pl.BlockSpec((1, tR, C), lambda b, r: (b, r, 0)),        # v
            ],
        ),
        compiler_params=pltpu.CompilerParams(
            dimension_semantics=("parallel", "parallel"),
            vmem_limit_bytes=vmem_limit),
    )(x, w_kv, b_kv)

    # ---------------- pass 2: criss-cross attention ------------------------
    tH = tile_h or _pick_tile_h(H, W, C, Cqp, int(vmem_limit * 0.85))
    assert H % tH == 0 and ((tH * W) % 8 == 0 or tH == H), (tH, H, W)

    kernel = functools.partial(_cca_attn_kernel, H=H, W=W, C=C, Cqp=Cqp, R=tH)
    out = pl.pallas_call(
        kernel,
        out_shape=jax.ShapeDtypeStruct((B, rows, C), jnp.bfloat16),
        grid_spec=pltpu.PrefetchScalarGridSpec(
            num_scalar_prefetch=0,
            grid=(B, H // tH),
            in_specs=[
                pl.BlockSpec(memory_space=pltpu.MemorySpace.SMEM),        # gamma
                pl.BlockSpec((1, tH * W, C), lambda b, t: (b, t, 0)),     # x tile
                pl.BlockSpec((C, Cqp), lambda b, t: (0, 0)),              # W_q (padded)
                pl.BlockSpec((1, Cqp), lambda b, t: (0, 0)),              # b_q (padded)
                pl.BlockSpec((1, rows, Cqp), lambda b, t: (b, 0, 0)),     # k resident
                pl.BlockSpec((1, rows, C), lambda b, t: (b, 0, 0)),       # v resident
            ],
            out_specs=pl.BlockSpec((1, tH * W, C), lambda b, t: (b, t, 0)),
        ),
        compiler_params=pltpu.CompilerParams(
            dimension_semantics=("parallel", "parallel"),
            vmem_limit_bytes=vmem_limit),
    )(gamma.reshape(1, 1).astype(jnp.float32), x, w_q, b_q, k_arr, v_arr)

    return jnp.transpose(out.reshape(B, H, W, C), (0, 3, 1, 2)).astype(jnp.float32)


# --------------------------------------------------------------------------
# pure-JAX f32 reference (identical semantics to the PyTorch module)
# --------------------------------------------------------------------------
def criss_cross_attention_ref(x_nchw, wq, bq, wk, bk, wv, bv, gamma):
    B, C, H, W = x_nchw.shape
    x = jnp.transpose(x_nchw, (0, 2, 3, 1)).astype(jnp.float32)
    q = jnp.einsum('bhwc,dc->bhwd', x, wq) + bq
    k = jnp.einsum('bhwc,dc->bhwd', x, wk) + bk
    v = jnp.einsum('bhwc,dc->bhwd', x, wv) + bv
    eH = jnp.einsum('bhwd,bgwd->bhwg', q, k)
    eH = jnp.where(jnp.eye(H, dtype=bool)[:, None, :], -jnp.inf, eH)
    eW = jnp.einsum('bhwd,bhgd->bhwg', q, k)
    att = jax.nn.softmax(jnp.concatenate([eH, eW], axis=-1), axis=-1)
    aH, aW = att[..., :H], att[..., H:]
    oH = jnp.einsum('bhwg,bgwc->bhwc', aH, v)
    oW = jnp.einsum('bhwg,bhgc->bhwc', aW, v)
    out = gamma.reshape(()) * (oH + oW) + x
    return jnp.transpose(out, (0, 3, 1, 2))


if __name__ == "__main__":
    B, C, H, W = 2, 32, 16, 16          # in_dim = 32 -> query/key channels = 4
    Cq = C // 8
    key = jax.random.PRNGKey(0)
    k1, k2, k3, k4, k5, k6, k7 = jax.random.split(key, 7)

    x = jax.random.normal(k1, (B, C, H, W), jnp.float32)
    # 1x1 conv weights (PyTorch (out, in, 1, 1), squeezed to (out, in))
    wq = 0.1 * jax.random.normal(k2, (Cq, C), jnp.float32)
    bq = 0.1 * jax.random.normal(k3, (Cq,), jnp.float32)
    wk = 0.1 * jax.random.normal(k4, (Cq, C), jnp.float32)
    bk = 0.1 * jax.random.normal(k5, (Cq,), jnp.float32)
    wv = 0.1 * jax.random.normal(k6, (C, C), jnp.float32)
    bv = 0.1 * jax.random.normal(k7, (C,), jnp.float32)
    # nn.Parameter(torch.zeros(1)) -> gamma starts at 0 which would trivially
    # return x; use a nonzero value so the attention path is exercised.
    gamma = jnp.array([0.5], jnp.float32)

    # tile_h=8 / row_tile=128 force multi-tile grids even at this small shape
    # so the H-tiled path (resident k/v, masked-offset softmax) is exercised.
    out = criss_cross_attention(x, wq, bq, wk, bk, wv, bv, gamma,
                                tile_h=8, row_tile=128)
    out = jax.block_until_ready(out)

    ref = criss_cross_attention_ref(x, wq, bq, wk, bk, wv, bv, gamma)
    assert out.shape == (B, C, H, W)
    max_err = float(jnp.max(jnp.abs(out - ref)))
    # tolerance relaxed for the bf16 I/O + bf16 MXU path (f32 accumulation)
    assert jnp.allclose(out, ref, rtol=3e-2, atol=3e-2), (
        "max abs err = %e" % max_err)
    print("KERNEL_OK")
</pallas_src>

<mosaic_0001>
module attributes {stable_mosaic.version = 11 : i64} {
  func.func @_kv_proj_kernel(%arg0: i32, %arg1: i32, %arg2: memref<1x128x32xbf16, #tpu.memory_space<vmem>>, %arg3: memref<32x160xbf16, #tpu.memory_space<vmem>>, %arg4: memref<1x160xf32, #tpu.memory_space<vmem>>, %arg5: memref<1x128x128xbf16, #tpu.memory_space<vmem>>, %arg6: memref<1x128x32xbf16, #tpu.memory_space<vmem>>) attributes {dimension_semantics = [#tpu.dimension_semantics<parallel>, #tpu.dimension_semantics<parallel>], iteration_bounds = array<i64: 2, 2>, scalar_prefetch = 0 : i64, scratch_operands = 0 : i64, tpu.core_type = #tpu.core_type<tc>, window_params = [{transform_indices = @transform_0, window_bounds = array<i64: 1, 128, 32>}, {pipeline_mode = #tpu.pipeline_mode<synchronous>, transform_indices = @transform_1, window_bounds = array<i64: 32, 160>}, {pipeline_mode = #tpu.pipeline_mode<synchronous>, transform_indices = @transform_2, window_bounds = array<i64: 1, 160>}, {transform_indices = @transform_3, window_bounds = array<i64: 1, 128, 128>}, {transform_indices = @transform_4, window_bounds = array<i64: 1, 128, 32>}]} {
    %c0 = arith.constant 0 : index
    %c0_0 = arith.constant 0 : index
    %c0_1 = arith.constant 0 : index
    %0 = vector.load %arg2[%c0, %c0_0, %c0_1] : memref<1x128x32xbf16, #tpu.memory_space<vmem>>, vector<1x128x32xbf16>
    %1 = vector.shape_cast %0 : vector<1x128x32xbf16> to vector<128x32xbf16>
    %c0_2 = arith.constant 0 : index
    %c0_3 = arith.constant 0 : index
    %2 = vector.load %arg3[%c0_2, %c0_3] : memref<32x160xbf16, #tpu.memory_space<vmem>>, vector<32x160xbf16>
    %cst = arith.constant dense<0.000000e+00> : vector<128x160xf32>
    %3 = tpu.matmul %1, %2, %cst {dimension_numbers = #tpu.dot_dimension_numbers<[1], [0], [0], [1], [0, 0, 1, 1], [], []>} : vector<128x32xbf16>, vector<32x160xbf16>, vector<128x160xf32> -> vector<128x160xf32>
    %c0_4 = arith.constant 0 : index
    %c0_5 = arith.constant 0 : index
    %4 = vector.load %arg4[%c0_4, %c0_5] : memref<1x160xf32, #tpu.memory_space<vmem>>, vector<1x160xf32>
    %5 = vector.broadcast %4 : vector<1x160xf32> to vector<128x160xf32>
    %6 = arith.addf %3, %5 : vector<128x160xf32>
    %7 = vector.extract_strided_slice %6 {offsets = [0, 0], sizes = [128, 128], strides = [1, 1]} : vector<128x160xf32> to vector<128x128xf32>
    %8 = arith.truncf %7 : vector<128x128xf32> to vector<128x128xbf16>
    %c0_6 = arith.constant 0 : index
    %c0_7 = arith.constant 0 : index
    %c0_8 = arith.constant 0 : index
    %9 = vector.load %arg5[%c0_6, %c0_7, %c0_8] : memref<1x128x128xbf16, #tpu.memory_space<vmem>>, vector<1x128x128xbf16>
    %10 = vector.shape_cast %9 : vector<1x128x128xbf16> to vector<128x128xbf16>
    %11 = vector.shape_cast %8 : vector<128x128xbf16> to vector<1x128x128xbf16>
    tpu.vector_store %arg5[%c0_6, %c0_7, %c0_8], %11 {strides = array<i32>} : memref<1x128x128xbf16, #tpu.memory_space<vmem>>, vector<1x128x128xbf16>,
    %12 = vector.extract_strided_slice %6 {offsets = [0, 128], sizes = [128, 32], strides = [1, 1]} : vector<128x160xf32> to vector<128x32xf32>
    %13 = arith.truncf %12 : vector<128x32xf32> to vector<128x32xbf16>
    %c0_9 = arith.constant 0 : index
    %c0_10 = arith.constant 0 : index
    %c0_11 = arith.constant 0 : index
    %14 = vector.load %arg6[%c0_9, %c0_10, %c0_11] : memref<1x128x32xbf16, #tpu.memory_space<vmem>>, vector<1x128x32xbf16>
    %15 = vector.shape_cast %14 : vector<1x128x32xbf16> to vector<128x32xbf16>
    %16 = vector.shape_cast %13 : vector<128x32xbf16> to vector<1x128x32xbf16>
    tpu.vector_store %arg6[%c0_9, %c0_10, %c0_11], %16 {strides = array<i32>} : memref<1x128x32xbf16, #tpu.memory_space<vmem>>, vector<1x128x32xbf16>,
    return
  }
  func.func @transform_0(%arg0: i32, %arg1: i32) -> (i32, i32, i32) {
    %c0_i32 = arith.constant 0 : i32
    %c0_i32_0 = arith.constant 0 : i32
    return %arg0, %arg1, %c0_i32 : i32, i32, i32
  }
  func.func @transform_1(%arg0: i32, %arg1: i32) -> (i32, i32) {
    %c0_i32 = arith.constant 0 : i32
    %c0_i32_0 = arith.constant 0 : i32
    %c0_i32_1 = arith.constant 0 : i32
    return %c0_i32, %c0_i32_0 : i32, i32
  }
  func.func @transform_2(%arg0: i32, %arg1: i32) -> (i32, i32) {
    %c0_i32 = arith.constant 0 : i32
    %c0_i32_0 = arith.constant 0 : i32
    %c0_i32_1 = arith.constant 0 : i32
    return %c0_i32, %c0_i32_0 : i32, i32
  }
  func.func @transform_3(%arg0: i32, %arg1: i32) -> (i32, i32, i32) {
    %c0_i32 = arith.constant 0 : i32
    %c0_i32_0 = arith.constant 0 : i32
    return %arg0, %arg1, %c0_i32 : i32, i32, i32
  }
  func.func @transform_4(%arg0: i32, %arg1: i32) -> (i32, i32, i32) {
    %c0_i32 = arith.constant 0 : i32
    %c0_i32_0 = arith.constant 0 : i32
    return %arg0, %arg1, %c0_i32 : i32, i32, i32
  }
}

</mosaic_0001>

<bundles_post_ra>
// kernel: tpu_custom_call.1
= control target key start
LH: loop header
LB: loop body
LE: loop exit
PB: predicated region body
PF: predicated region fallthrough
CT: control target
= control target key end

     0   :  { %s1818_s0 = inlined_call_operand.hbm [shape: bf16[2,256,32], index: 0, kind: input, shape index: {}]   ;;  %s1819_s1 = inlined_call_operand.hbm [shape: bf16[32,160], index: 1, kind: input, shape index: {}]   ;;  %s1820_s2 = inlined_call_operand.hbm [shape: f32[1,160], index: 2, kind: input, shape index: {}]   ;;  %s1821_s3 = inlined_call_operand.hbm [shape: bf16[2,256,128], index: 3, kind: output, shape index: {0}]   ;;  %s1822_s4 = inlined_call_operand.hbm [shape: bf16[2,256,32], index: 4, kind: output, shape index: {1}]  }
   0x1   :  { %1831 = sst [smem:[#allocation18_spill]] %s1819_s1 }
   0x2   :  { %1832 = sst [smem:[#allocation19_spill]] %s1820_s2 }
   0x3   :  { %1833 = sst [smem:[#allocation20_spill]] %s1822_s4 }
   0x4   :  { %10 = vsyncpa [#allocation3], 0 }
   0x5   :  { %12 = vsyncpa [#allocation3 + $0x1], 0 }
   0x6   :  { %13 = vsyncpa [#allocation6], 0 }
   0x7   :  { %14 = vsyncpa [#allocation4], 0 }
   0x8   :  { %16 = vsyncpa [#allocation4 + $0x1], 0 }
   0x9   :  { %17 = vsyncpa [#allocation10], 0 }
   0xa   :  { %19 = vsyncpa [#allocation10 + $0x1], 0  ;;  %s1397_s15 = smov 0   ;;  %s1399_s16 = smov 0  }
   0xb   :  { %s1401_s17 = smov 0   ;;  %s1403_s18 = smov 0  }
   0xc   :  { %s1405_s19 = smov 0   ;;  %s1407_s20 = smov 0  }
   0xd   :  { %s1409_s21 = smov 0   ;;  %s1411_s22 = smov 0  }
   0xe LB: > { %1834 = sst [smem:[#allocation15_spill]] %s1330_s15  ;;  %s852_s23 = sadd.s32 4294967295, %s1358_s22   ;;  %s1358_s22 = sphi %s1411_s22, %s25_s22   ;;  %s1354_s21 = sphi %s1409_s21, %s1863_s21   ;;  %s1350_s20 = sphi %s1407_s20, %s1862_s20   ;;  %s1346_s19 = sphi %s1405_s19, %s1861_s19   ;;  %s1342_s18 = sphi %s1403_s18, %s1860_s18   ;;  %s1338_s17 = sphi %s1401_s17, %s1859_s17   ;;  %s1334_s16 = sphi %s1399_s16, %s1858_s16   ;;  %s1330_s15 = sphi %s1397_s15, %s1857_s15  }
   0xf   : > { %s853_s24 = sadd.s32 4294967294, %s1358_s22   ;;  %p59_p0 = scmp.ne.s32.totalorder %s1334_s16, %s1330_s15 }
  0x10   : > { %p1441_p1 = scmp.eq.s32.totalorder %s852_s23, 0  ;;  %p1445_p2 = scmp.eq.s32.totalorder %s852_s23, 3 }
  0x11   : > { %p133_p3 = scmp.eq.s32.totalorder %s853_s24, 3  ;;  %p854_p5 = scmp.ge.s32.totalorder %s1358_s22, 1 }
  0x12   : > { %s1835_s25 = scalar_select %p1441_p1, 1, 0 }
  0x13   : > { %s1836_s26 = scalar_select %p1445_p2, 1, 0 }
  0x14   : > { %p1451_p4 = por %p1441_p1, %p59_p0  ;;  %p1456_p6 = por %p133_p3, %p59_p0 }
  0x15   : > { %p168_p7 = scmp.lt.s32.totalorder %s1358_s22, 5  ;;  %s1360_s30 = smov [#allocation5]  }
  0x16   : > { %s1837_s27 = scalar_select %p1451_p4, 1, 0 }
  0x17   : > { %s1838_s28 = scalar_select %p1456_p6, 1, 0 }
  0x18   : > { %p1461_p8 = pnand %p854_p5, %p168_p7  ;;  %s180_s5 = sshll.u32 %s1360_s30, 4  ;;  %s181_s5 = int_to_ptr.vmem [resolvable:$true] %s180_s5 }
  0x19   : > { %1839 = sst [smem:[#allocation16_spill]] %s1838_s28  ;;  %s1361_s7 = smov [#allocation7]  }
  0x1a   : > { %s1840_s29 = scalar_select %p1461_p8, 1, 0 }
  0x1b   : > { %p1027_p9 = pneg %p1461_p8  ;;  %s194_s8 = sshll.u32 %s1361_s7, 4  ;;  %s1473_s8 = int_to_ptr.vmem [resolvable:$true] %s194_s8 }
  0x1c   : > { %s1842_s1 = sld [smem:[#allocation18_spill]] }
  0x1d   : > { %p1469_p10 = pnand %p1027_p9, %p1441_p1 }
  0x1f   : > { %p1140_p12 = pneg %p1469_p10 }
  0x22   : > { %s1138_s11 = scalar_lea.hbm %s1842_s1, 512 }
  0x23   : > { %p1139_p11 = scmp.ne.s32.totalorder %s1842_s1, %s1138_s11  ;;  %p1145_p3 = scmp.lt.u32.totalorder %s1138_s11, %s1842_s1 }
  0x25   : > { %p1141_p13 = pnand %p1140_p12, %p1139_p11 }
  0x27   : > { %p1142_p0 = pneg %p1141_p13 }
  0x29   : > { %p1147_p5 = pnand %p1145_p3, %p1142_p0 }
  0x2b   : > { %1150 = shalt.err (!%p1147_p5)
}
  0x2c   : > { %s1151_s24 = scalar_lea.vmem %s181_s5, 512  ;;  %p1159_p1 = scmp.lt.s32.totalorder %s181_s5, %s181_s5 }
  0x2d   : > { %p1152_p7 = scmp.ne.s32.totalorder %s181_s5, %s1151_s24  ;;  %p1160_p4 = scmp.lt.s32.totalorder %s1151_s24, %s1151_s24 }
  0x2f   : > { %p1154_p9 = pnand %p1152_p7, %p1140_p12  ;;  %p1161_p8 = por %p1160_p4, %p1159_p1 }
  0x31   : > { %p1155_p6 = pneg %p1154_p9 }
  0x33   : > { %p1162_p2 = pnand %p1161_p8, %p1155_p6 }
  0x35   : > { %1165 = shalt.err (!%p1162_p2)
}
  0x36   : > { %s1362_s30 = smov 128   ;;  %s1363_s7 = smov 8  }
  0x37   : > { %1030 = dma.hbm_to_vmem [thread:$0]  (!%p1469_p10), %s1842_s1, 512, %s181_s5, [#allocation6], %s1362_s30, %s1362_s30, %s1363_s7  }
  0x38   : > { %s1843_s2 = sld [smem:[#allocation19_spill]] }
  0x3e   : > { %s1166_s13 = scalar_lea.hbm %s1843_s2, 32 }
  0x3f   : > { %p1167_p11 = scmp.ne.s32.totalorder %s1843_s2, %s1166_s13  ;;  %p1173_p4 = scmp.lt.u32.totalorder %s1166_s13, %s1843_s2 }
  0x41   : > { %p1169_p1 = pnand %p1167_p11, %p1140_p12 }
  0x43   : > { %p1170_p2 = pneg %p1169_p1 }
  0x45   : > { %p1175_p6 = pnand %p1173_p4, %p1170_p2 }
  0x47   : > { %1178 = shalt.err (!%p1175_p6)
}
  0x48   : > { %s1179_s5 = scalar_lea.vmem %s1473_s8, 32  ;;  %p1187_p3 = scmp.lt.s32.totalorder %s1473_s8, %s1473_s8 }
  0x49   : > { %p1180_p8 = scmp.ne.s32.totalorder %s1473_s8, %s1179_s5  ;;  %p1188_p5 = scmp.lt.s32.totalorder %s1179_s5, %s1179_s5 }
  0x4b   : > { %p1182_p13 = pnand %p1180_p8, %p1140_p12  ;;  %p1189_p7 = por %p1188_p5, %p1187_p3 }
  0x4d   : > { %p1183_p0 = pneg %p1182_p13 }
  0x4f   : > { %p1190_p9 = pnand %p1189_p7, %p1183_p0 }
  0x51   : > { %1193 = shalt.err (!%p1190_p9)
}
  0x52   : > { %1033 = dma.hbm_to_vmem [thread:$0]  (!%p1469_p10), %s1843_s2, 32, %s1473_s8, [#allocation6]  }
  0x53   : > { %s34_s7 = sadd.s32 1, %s1350_s20  ;;  %s37_s9 = sadd.s32 1, %s1354_s21 }
  0x54   : > { %p35_p12 = scmp.ge.s32.totalorder %s34_s7, 2  ;;  %s46_s6 = sadd.s32 1, %s1338_s17 }
  0x55   : > { %p53_p11 = scmp.ne.s32.totalorder %s1338_s17, %s1334_s16  ;;  %p54_p1 = scmp.eq.s32.totalorder %s1358_s22, 0 }
  0x56   : > { %s1865_s7 = smov (%p35_p12, %s34_s7), 0  ;;  %s1867_s9 = smov (!%p35_p12, %s37_s9), %s1354_s21 }
  0x57   : > { %1844 = sst [smem:[#allocation17_spill]] %s1865_s7  ;;  %s42_s10 = ssub.s32 %s1350_s20, %s1865_s7 }
  0x58   : > { %p1533_p2 = por %p54_p1, %p53_p11  ;;  %p39_p10 = scmp.ge.s32.totalorder %s1867_s9, 2 }
  0x59   : > { %p1846_p4 = scmp.ne.s32.totalorder %s1836_s26, 0  ;;  %p1047_p8 = scmp.lt.s32.totalorder %s1358_s22, 4 }
  0x5a   : > { %s205_s12 = sand.u32 1, %s1338_s17   ;;  %s1869_s9 = smov (%p39_p10, %s1867_s9), 0 }
  0x5b   : > { %p1539_p6 = por %p1846_p4, %p53_p11  ;;  %s858_s13 = sshll.u32 %s205_s12, 6 }
  0x5c   : > { %s41_s14 = ssub.s32 %s1354_s21, %s1869_s9  ;;  %s859_s24 = sshll.u32 %s1350_s20, 4 }
  0x5d   : > { %s43_s23 = sor.u32 %s42_s10, %s41_s14  ;;  %s860_s5 = sshll.u32 %s1354_s21, 5 }
  0x5e   : > { %p44_p13 = scmp.eq.s32.totalorder %s43_s23, 0  ;;  %s215_s28 = sadd.s32 %s860_s5, %s859_s24 }
  0x5f   : > { %s209_s30 = scalar_lea.vmem [#allocation2], %s858_s13  ;;  %s861_s2 = sshll.u32 %s215_s28, 6 }
  0x60   : > { %s218_s26 = sshll.u32 %s209_s30, 4  ;;  %s1559_s4 = scalar_lea.hbm %s1818_s0, %s861_s2  ;;  %s1554_s26 = int_to_ptr.vmem [resolvable:$true] %s218_s26 }
  0x61   : > { %s1552_s1 = scalar_select %p44_p13, %s1338_s17, %s46_s6  }
  0x62   : > { %p1565_p0 = pnand %p1047_p8, %p1533_p2  ;;  %s1569_s6 = scalar_lea.sflag [#allocation3], %s205_s12 }
  0x63   : > { %s1194_s13 = scalar_lea.hbm %s1559_s4, 1024  ;;  %s1199_s7 = scalar_lea.hbm %s1818_s0, 4096 }
  0x64   : > { %p1195_p3 = scmp.ne.s32.totalorder %s1559_s4, %s1194_s13  ;;  %p1196_p5 = pneg %p1565_p0 }
  0x65   : > { %p1200_p12 = scmp.lt.u32.totalorder %s1559_s4, %s1818_s0  ;;  %p1201_p11 = scmp.lt.u32.totalorder %s1199_s7, %s1194_s13 }
  0x66   : > { %p1197_p7 = pnand %p1196_p5, %p1195_p3  ;;  %p1203_p2 = scmp.lt.u32.totalorder %s1194_s13, %s1559_s4 }
  0x67   : > { %p1202_p1 = por %p1201_p11, %p1200_p12 }
  0x68   : > { %p1198_p9 = pneg %p1197_p7 }
  0x69   : > { %p1204_p10 = por %p1203_p2, %p1202_p1 }
  0x6b   : > { %p1205_p4 = pnand %p1204_p10, %p1198_p9 }
  0x6d   : > { %1208 = shalt.err (!%p1205_p4)
}
  0x6e   : > { %s1209_s12 = scalar_lea.vmem %s1554_s26, 1024  ;;  %s1364_s23 = smov [#allocation2]  }
  0x6f   : > { %p1210_p8 = scmp.ne.s32.totalorder %s1554_s26, %s1209_s12  ;;  %s1214_s24 = sshll.u32 %s1364_s23, 4  ;;  %s1215_s24 = int_to_ptr.vmem [resolvable:$false] %s1214_s24 }
  0x70   : > { %s1216_s5 = scalar_lea.vmem %s1215_s24, 2048  ;;  %p1217_p7 = scmp.lt.s32.totalorder %s1554_s26, %s1215_s24 }
  0x71   : > { %p1212_p13 = pnand %p1210_p8, %p1196_p5  ;;  %p1218_p12 = scmp.lt.s32.totalorder %s1216_s5, %s1209_s12 }
  0x73   : > { %p1213_p3 = pneg %p1212_p13  ;;  %p1219_p11 = por %p1218_p12, %p1217_p7 }
  0x75   : > { %p1220_p1 = pnand %p1219_p11, %p1213_p3 }
  0x77   : > { %1223 = shalt.err (!%p1220_p1)
}
  0x78   : > { %s1365_s28 = smov 64   ;;  %s1366_s30 = smov 4  }
  0x79   : > { %1037 = dma.hbm_to_vmem [thread:$0]  (!%p1565_p0), %s1559_s4, 1024, %s1554_s26, %s1569_s6, %s1365_s28, %s1365_s28, %s1366_s30  }
  0x7a   : > { %p1849_p5 = scmp.ne.s32.totalorder %s1840_s29, 0 }
  0x7b   : > { %s1600_s13 = sand.u32 (!%p1849_p5), 1, %s1334_s16   ;;  %p1850_p9 = scmp.ne.s32.totalorder (!%p1849_p5), %s1837_s27, 0 }
  0x7c   : > { %230 = sbr.rel (%p1849_p5) target bundleno = 426 (0x1aa), region = 32  ;;  %s1603_s2 = sshll.u32 (!%p1849_p5), %s1600_s13, 6 }
  0x7d   : > { %s233_s15 = scalar_lea.sflag (!%p1849_p5), [#allocation3], %s1600_s13  ;;  %s1607_s7 = scalar_lea.vmem (!%p1849_p5), [#allocation2], %s1603_s2 }
  0x83   : > { %1313 = dma.done.wait (%p1850_p9), %s233_s15, 1024  }
  0x84   : > { %1315 = vsyncadd (%p1850_p9), %s233_s15, 4294966272  ;;  %p1851_p0 = scmp.ne.s32.totalorder %s1835_s25, 0 }
  0x86   : > { %1317 = dma.done.wait (%p1851_p0), [#allocation6], 544  }
  0x87   : > { %1319 = vsyncadd (%p1851_p0), [#allocation6], 4294966752  ;;  %v1367_v0 = vmov 0   ;;  %v1124_v1 = vld [vmem:[#allocation5 + $0x4] ss:$8 sps:$4 sm:$0xff]   ;;  %vm370_vm0 = vcmask 261120   ;;  %v300_v13 = vlaneseq }
  0x88   : > { %427 = vmatprep.mubr.bf16.mxu0 %v1367_v0  ;;  %467 = vmatprep.mubr.bf16.mxu1 %v1367_v0  ;;  %v1126_v2 = vld [vmem:[#allocation5] ss:$8 sps:$4 sm:$0xff]   ;;  %v1127_v3 = vld [vmem:[#allocation5 + $0x14] ss:$8 sps:$4 sm:$0xff]   ;;  %v1129_v4 = vld [vmem:[#allocation5 + $0x10] ss:$8 sps:$4 sm:$0xff]  }
  0x89   : > { %395 = vmatprep.subr.bf16.mxu0 %v1124_v1  ;;  %1009 = vmatprep.subr.bf16.mxu1 %v1124_v1  ;;  %v1130_v5 = vld [vmem:[%s1607_s7] sm:$0xff]   ;;  %v1132_v7 = vld [vmem:[%s1607_s7 + $0x8] sm:$0xff]   ;;  %v1134_v9 = vld [vmem:[%s1607_s7 + $0x10] sm:$0xff]   ;;  %v301_v14 = vshrl.u32 %v300_v13, 7  ;;  %vm652_vm1 = vcmask 257024   ;;  %s1646_s4 = scalar_lea.vmem [#allocation9], %s1603_s2 }
  0x8a   : > { %396 = vmatpush1.bf16.msra.mxu0 %v1126_v2  ;;  %1011 = vmatpush1.bf16.msra.mxu1 %v1126_v2  ;;  %v1131_v6 = vld [vmem:[%s1607_s7 + $0x20] sm:$0xff]   ;;  %v1133_v8 = vld [vmem:[%s1607_s7 + $0x28] sm:$0xff]   ;;  %v1135_v10 = vld [vmem:[%s1607_s7 + $0x30] sm:$0xff]   ;;  %s1653_s25 = scalar_lea.vmem [#allocation8], %s1603_s2  ;;  %s922_s27 = sshll.u32 %s1342_s18, 4 }
  0x8b   : > { %397 = vmatprep.subr.bf16.mxu0 %v1127_v3  ;;  %1010 = vmatprep.subr.bf16.mxu1 %v1127_v3  ;;  %v1136_v11 = vld [vmem:[%s1607_s7 + $0x18] sm:$0xff]   ;;  %v306_v15 = vsub.s32 1, %v301_v14  ;;  %v298_v16 = vld [vmem:[#allocation7] sm:$0x3]  ;;  %v302_v17 = vsub.s32 0, %v301_v14  ;;  %s923_s29 = sshll.u32 %s1346_s19, 5 }
  0x8c   : > { %v1137_v12 = vld [vmem:[%s1607_s7 + $0x38] sm:$0xff]   ;;  %s1693_s26 = sadd.s32 %s923_s29, %s922_s27  ;;  %s690_s18 = sshll.u32 %s1653_s25, 4  ;;  %s1703_s18 = int_to_ptr.vmem [resolvable:$true] %s690_s18 }
  0x8d   : > { %v1633_v18 = vrot.slane %v298_v16, %v306_v15  ;;  %v1635_v19 = vrot.slane %v298_v16, %v302_v17  ;;  %s924_s19 = sshll.u32 %s1693_s26, 6  ;;  %s708_s10 = sshll.u32 %s1646_s4, 4  ;;  %s1728_s10 = int_to_ptr.vmem [resolvable:$true] %s708_s10 }
  0x8e   : > { %398 = vmatpush1.bf16.msra.mxu0 %v1129_v4  ;;  %1012 = vmatpush1.bf16.msra.mxu1 %v1129_v4  ;;  %s1717_s14 = scalar_lea.hbm %s1821_s3, %s924_s19  ;;  %s1852_s24 = sld [smem:[#allocation20_spill]] }
  0x8f   : > { %s670_s28 = scalar_lea.sflag [#allocation4], %s1600_s13  ;;  %s1224_s30 = scalar_lea.vmem %s1703_s18, 1024 }
  0x90   : > { %p1225_p2 = scmp.ne.s32.totalorder %s1703_s18, %s1224_s30  ;;  %s1368_s2 = smov [#allocation8]  }
  0x91   : > { %880 = vmatmul.mubr.msk.bf16.vlgmr.msra.gmra.mrb[0].mxu0 %vm370_vm0, %v1130_v5  ;;  %884 = vmatmul.mubr.msk.bf16.vlgmr.msra.gmra.mrb[0].mxu1 %vm370_vm0, %v1131_v6  ;;  %s1228_s15 = sshll.u32 %s1368_s2, 4  ;;  %s1229_s15 = int_to_ptr.vmem [resolvable:$false] %s1228_s15 }
  0x92   : > { %437 = vmatprep.mubr.bf16.mxu0 %v1367_v0  ;;  %477 = vmatprep.mubr.bf16.mxu1 %v1367_v0  ;;  %p1226_p10 = pnand %p1225_p2, %p1539_p6  ;;  %s1230_s7 = scalar_lea.vmem %s1229_s15, 2048 }
  0x93   : > { %p1231_p8 = scmp.lt.s32.totalorder %s1703_s18, %s1229_s15  ;;  %p1232_p13 = scmp.lt.s32.totalorder %s1230_s7, %s1224_s30 }
  0x94   : > { %s1722_s5 = scalar_lea.hbm %s1852_s24, %s924_s19  ;;  %p1227_p4 = pneg %p1226_p10 }
  0x95   : > { %p1233_p3 = por %p1232_p13, %p1231_p8 }
  0x97   : > { %p1234_p7 = pnand %p1233_p3, %p1227_p4 }
  0x99   : > { %881 = vmatmul.mubr.msk.bf16.gmra.mrb[4].mxu0 %vm370_vm0, %v1132_v7  ;;  %885 = vmatmul.mubr.msk.bf16.gmra.mrb[4].mxu1 %vm370_vm0, %v1133_v8 }
  0x9a   : > { %447 = vmatprep.mubr.bf16.mxu0 %v1367_v0  ;;  %487 = vmatprep.mubr.bf16.mxu1 %v1367_v0 }
  0xa1   : > { %882 = vmatmul.mubr.msk.bf16.gmra.mrb[8].mxu0 %vm370_vm0, %v1134_v9  ;;  %886 = vmatmul.mubr.msk.bf16.gmra.mrb[8].mxu1 %vm370_vm0, %v1135_v10 }
  0xa2   : > { %457 = vmatprep.mubr.bf16.mxu0 %v1367_v0  ;;  %497 = vmatprep.mubr.bf16.mxu1 %v1367_v0 }
  0xa9   : > { %883 = vmatmul.mubr.msk.bf16.gmra.mrb[12].mxu0 %vm370_vm0, %v1136_v11  ;;  %887 = vmatmul.mubr.msk.bf16.gmra.mrb[12].mxu1 %vm370_vm0, %v1137_v12 }
 0x164   : > { %v429_v20 = vpop.f32.mrb[0].mxu0  ;;  %v469_v21 = vpop.f32.mrb[0].mxu1 }
 0x165   : > { %v431_v22 = vpop.f32.mrb[1].mxu0  ;;  %v471_v23 = vpop.f32.mrb[1].mxu1  ;;  %v430_v28 = vadd.f32 %v429_v20, %v1635_v19  ;;  %v470_v29 = vadd.f32 %v469_v21, %v1635_v19 }
 0x166   : > { %v432_v24 = vadd.f32 %v431_v22, %v1633_v18  ;;  %v472_v25 = vadd.f32 %v471_v23, %v1633_v18  ;;  %v433_v26 = vpop.f32.mrb[2].mxu0  ;;  %v473_v27 = vpop.f32.mrb[2].mxu1 }
 0x167   : > { %v434_v30 = vadd.f32 %v433_v26, %v1635_v19  ;;  %v474_v31 = vadd.f32 %v473_v27, %v1635_v19  ;;  %v435_v32 = vpop.f32.mrb[3].mxu0  ;;  %v475_v33 = vpop.f32.mrb[3].mxu1 }
 0x168   : > { %v946_v34 = vpack.c.bf16 %v432_v24, %v432_v24  ;;  %v954_v35 = vpack.c.bf16 %v472_v25, %v472_v25  ;;  %v436_v36 = vadd.f32 %v435_v32, %v1633_v18  ;;  %v476_v37 = vadd.f32 %v475_v33, %v1633_v18 }
 0x169   : > { %v965_v38 = vpack.c.bf16 %v434_v30, %v430_v28  ;;  %v985_v39 = vpack.c.bf16 %v474_v31, %v470_v29 }
 0x16a   : > { %653 = vst.msk [vmem:[%s1646_s4] sm:$0xf] %vm652_vm1, %v946_v34  ;;  %661 = vst.msk [vmem:[%s1646_s4 + $0x20] sm:$0xf] %vm652_vm1, %v954_v35  ;;  %v947_v40 = vpack.c.bf16 %v436_v36, %v436_v36  ;;  %v955_v41 = vpack.c.bf16 %v476_v37, %v476_v37 }
 0x16b   : > { %966 = vst [vmem:[%s1653_s25] sm:$0xff] %v965_v38   ;;  %1005 = vst [vmem:[%s1653_s25 + $0x20] sm:$0xff] %v985_v39  }
 0x16c   : > { %654 = vst.msk [vmem:[%s1646_s4 + $0x4] sm:$0xf] %vm652_vm1, %v947_v40  ;;  %662 = vst.msk [vmem:[%s1646_s4 + $0x24] sm:$0xf] %vm652_vm1, %v955_v41  ;;  %v439_v42 = vpop.f32.mrb[4].mxu0  ;;  %v479_v43 = vpop.f32.mrb[4].mxu1 }
 0x16d   : > { %v441_v44 = vpop.f32.mrb[5].mxu0  ;;  %v481_v45 = vpop.f32.mrb[5].mxu1  ;;  %v440_v50 = vadd.f32 %v439_v42, %v1635_v19  ;;  %v480_v51 = vadd.f32 %v479_v43, %v1635_v19 }
 0x16e   : > { %v442_v46 = vadd.f32 %v441_v44, %v1633_v18  ;;  %v482_v47 = vadd.f32 %v481_v45, %v1633_v18  ;;  %v443_v48 = vpop.f32.mrb[6].mxu0  ;;  %v483_v49 = vpop.f32.mrb[6].mxu1 }
 0x16f   : > { %v444_v52 = vadd.f32 %v443_v48, %v1635_v19  ;;  %v484_v53 = vadd.f32 %v483_v49, %v1635_v19  ;;  %v445_v54 = vpop.f32.mrb[7].mxu0  ;;  %v485_v55 = vpop.f32.mrb[7].mxu1 }
 0x170   : > { %v948_v56 = vpack.c.bf16 %v442_v46, %v442_v46  ;;  %v956_v57 = vpack.c.bf16 %v482_v47, %v482_v47  ;;  %v446_v58 = vadd.f32 %v445_v54, %v1633_v18  ;;  %v486_v59 = vadd.f32 %v485_v55, %v1633_v18 }
 0x171   : > { %v970_v60 = vpack.c.bf16 %v444_v52, %v440_v50  ;;  %v990_v61 = vpack.c.bf16 %v484_v53, %v480_v51 }
 0x172   : > { %655 = vst.msk [vmem:[%s1646_s4 + $0x8] sm:$0xf] %vm652_vm1, %v948_v56  ;;  %663 = vst.msk [vmem:[%s1646_s4 + $0x28] sm:$0xf] %vm652_vm1, %v956_v57  ;;  %v949_v62 = vpack.c.bf16 %v446_v58, %v446_v58  ;;  %v957_v63 = vpack.c.bf16 %v486_v59, %v486_v59 }
 0x173   : > { %1002 = vst [vmem:[%s1653_s25 + $0x8] sm:$0xff] %v970_v60   ;;  %1006 = vst [vmem:[%s1653_s25 + $0x28] sm:$0xff] %v990_v61  }
 0x174   : > { %656 = vst.msk [vmem:[%s1646_s4 + $0xc] sm:$0xf] %vm652_vm1, %v949_v62  ;;  %664 = vst.msk [vmem:[%s1646_s4 + $0x2c] sm:$0xf] %vm652_vm1, %v957_v63  ;;  %v449_v0 = vpop.f32.mrb[8].mxu0  ;;  %v489_v1 = vpop.f32.mrb[8].mxu1 }
 0x175   : > { %v451_v2 = vpop.f32.mrb[9].mxu0  ;;  %v491_v3 = vpop.f32.mrb[9].mxu1  ;;  %v450_v8 = vadd.f32 %v449_v0, %v1635_v19  ;;  %v490_v9 = vadd.f32 %v489_v1, %v1635_v19 }
 0x176   : > { %v452_v4 = vadd.f32 %v451_v2, %v1633_v18  ;;  %v492_v5 = vadd.f32 %v491_v3, %v1633_v18  ;;  %v453_v6 = vpop.f32.mrb[10].mxu0  ;;  %v493_v7 = vpop.f32.mrb[10].mxu1 }
 0x177   : > { %v454_v10 = vadd.f32 %v453_v6, %v1635_v19  ;;  %v494_v11 = vadd.f32 %v493_v7, %v1635_v19  ;;  %v455_v12 = vpop.f32.mrb[11].mxu0  ;;  %v495_v13 = vpop.f32.mrb[11].mxu1 }
 0x178   : > { %v950_v14 = vpack.c.bf16 %v452_v4, %v452_v4  ;;  %v958_v15 = vpack.c.bf16 %v492_v5, %v492_v5  ;;  %v456_v16 = vadd.f32 %v455_v12, %v1633_v18  ;;  %v496_v17 = vadd.f32 %v495_v13, %v1633_v18 }
 0x179   : > { %v975_v20 = vpack.c.bf16 %v454_v10, %v450_v8  ;;  %v995_v21 = vpack.c.bf16 %v494_v11, %v490_v9 }
 0x17a   : > { %657 = vst.msk [vmem:[%s1646_s4 + $0x10] sm:$0xf] %vm652_vm1, %v950_v14  ;;  %665 = vst.msk [vmem:[%s1646_s4 + $0x30] sm:$0xf] %vm652_vm1, %v958_v15  ;;  %v951_v22 = vpack.c.bf16 %v456_v16, %v456_v16  ;;  %v959_v23 = vpack.c.bf16 %v496_v17, %v496_v17 }
 0x17b   : > { %1003 = vst [vmem:[%s1653_s25 + $0x10] sm:$0xff] %v975_v20   ;;  %1007 = vst [vmem:[%s1653_s25 + $0x30] sm:$0xff] %v995_v21  }
 0x17c   : > { %658 = vst.msk [vmem:[%s1646_s4 + $0x14] sm:$0xf] %vm652_vm1, %v951_v22  ;;  %666 = vst.msk [vmem:[%s1646_s4 + $0x34] sm:$0xf] %vm652_vm1, %v959_v23  ;;  %v459_v24 = vpop.f32.mrb[12].mxu0  ;;  %v499_v25 = vpop.f32.mrb[12].mxu1 }
 0x17d   : > { %v461_v26 = vpop.f32.mrb[13].mxu0  ;;  %v501_v27 = vpop.f32.mrb[13].mxu1  ;;  %v460_v32 = vadd.f32 %v459_v24, %v1635_v19  ;;  %v500_v33 = vadd.f32 %v499_v25, %v1635_v19 }
 0x17e   : > { %v462_v28 = vadd.f32 %v461_v26, %v1633_v18  ;;  %v502_v29 = vadd.f32 %v501_v27, %v1633_v18  ;;  %v463_v30 = vpop.f32.mrb[14].mxu0  ;;  %v503_v31 = vpop.f32.mrb[14].mxu1 }
 0x17f   : > { %v464_v34 = vadd.f32 %v463_v30, %v1635_v19  ;;  %v504_v35 = vadd.f32 %v503_v31, %v1635_v19  ;;  %v465_v36 = vpop.f32.mrb[15].mxu0  ;;  %v505_v37 = vpop.f32.mrb[15].mxu1 }
 0x180   : > { %v952_v38 = vpack.c.bf16 %v462_v28, %v462_v28  ;;  %v960_v39 = vpack.c.bf16 %v502_v29, %v502_v29  ;;  %v466_v40 = vadd.f32 %v465_v36, %v1633_v18  ;;  %v506_v41 = vadd.f32 %v505_v37, %v1633_v18 }
 0x181   : > { %v980_v19 = vpack.c.bf16 %v464_v34, %v460_v32  ;;  %v1000_v42 = vpack.c.bf16 %v504_v35, %v500_v33 }
 0x182   : > { %659 = vst.msk [vmem:[%s1646_s4 + $0x18] sm:$0xf] %vm652_vm1, %v952_v38  ;;  %667 = vst.msk [vmem:[%s1646_s4 + $0x38] sm:$0xf] %vm652_vm1, %v960_v39  ;;  %v953_v43 = vpack.c.bf16 %v466_v40, %v466_v40  ;;  %v961_v18 = vpack.c.bf16 %v506_v41, %v506_v41 }
 0x183   : > { %1004 = vst [vmem:[%s1653_s25 + $0x18] sm:$0xff] %v980_v19   ;;  %1008 = vst [vmem:[%s1653_s25 + $0x38] sm:$0xff] %v1000_v42  }
 0x184   : > { %660 = vst.msk [vmem:[%s1646_s4 + $0x1c] sm:$0xf] %vm652_vm1, %v953_v43  ;;  %668 = vst.msk [vmem:[%s1646_s4 + $0x3c] sm:$0xf] %vm652_vm1, %v961_v18 }
 0x185   : > { %1237 = shalt.err (!%p1234_p7)
}
 0x186   : > { %s1238_s4 = scalar_lea.hbm %s1717_s14, 1024  ;;  %s1242_s29 = scalar_lea.hbm %s1821_s3, 4096 }
 0x187   : > { %p1239_p12 = scmp.ne.s32.totalorder %s1717_s14, %s1238_s4  ;;  %p1243_p5 = scmp.lt.u32.totalorder %s1717_s14, %s1821_s3 }
 0x188   : > { %p1244_p9 = scmp.lt.u32.totalorder %s1242_s29, %s1238_s4  ;;  %p1246_p2 = scmp.lt.u32.totalorder %s1238_s4, %s1717_s14 }
 0x189   : > { %p1240_p11 = pnand %p1239_p12, %p1539_p6 }
 0x18a   : > { %p1245_p0 = por %p1244_p9, %p1243_p5 }
 0x18b   : > { %p1241_p1 = pneg %p1240_p11 }
 0x18c   : > { %p1247_p10 = por %p1246_p2, %p1245_p0 }
 0x18e   : > { %p1248_p4 = pnand %p1247_p10, %p1241_p1 }
 0x190   : > { %1251 = shalt.err (!%p1248_p4)
}
 0x191   : > { %s1369_s6 = smov 64   ;;  %s1370_s11 = smov 4  }
 0x192   : > { %1023 = dma.vmem_to_hbm [thread:$0]  (%p1539_p6), %s1703_s18, 1024, %s1717_s14, %s670_s28, %s1369_s6, %s1369_s6, %s1370_s11  }
 0x193   : > { %s675_s12 = scalar_lea.sflag [#allocation10], %s1600_s13  ;;  %s1252_s23 = scalar_lea.vmem %s1728_s10, 1024 }
 0x194   : > { %p1253_p8 = scmp.ne.s32.totalorder %s1728_s10, %s1252_s23  ;;  %s1371_s30 = smov [#allocation9]  }
 0x195   : > { %s1256_s2 = sshll.u32 %s1371_s30, 4  ;;  %s1257_s2 = int_to_ptr.vmem [resolvable:$false] %s1256_s2 }
 0x196   : > { %p1254_p13 = pnand %p1253_p8, %p1539_p6  ;;  %s1258_s15 = scalar_lea.vmem %s1257_s2, 2048 }
 0x197   : > { %p1259_p7 = scmp.lt.s32.totalorder %s1728_s10, %s1257_s2  ;;  %p1260_p12 = scmp.lt.s32.totalorder %s1258_s15, %s1252_s23 }
 0x198   : > { %p1255_p3 = pneg %p1254_p13 }
 0x199   : > { %p1261_p11 = por %p1260_p12, %p1259_p7 }
 0x19b   : > { %p1262_p1 = pnand %p1261_p11, %p1255_p3 }
 0x19d   : > { %1265 = shalt.err (!%p1262_p1)
}
 0x19e   : > { %s1266_s18 = scalar_lea.hbm %s1722_s5, 1024  ;;  %s1270_s7 = scalar_lea.hbm %s1852_s24, 4096 }
 0x19f   : > { %p1267_p5 = scmp.ne.s32.totalorder %s1722_s5, %s1266_s18  ;;  %p1271_p2 = scmp.lt.u32.totalorder %s1722_s5, %s1852_s24 }
 0x1a0   : > { %p1272_p10 = scmp.lt.u32.totalorder %s1270_s7, %s1266_s18  ;;  %p1274_p8 = scmp.lt.u32.totalorder %s1266_s18, %s1722_s5 }
 0x1a1   : > { %p1268_p9 = pnand %p1267_p5, %p1539_p6 }
 0x1a2   : > { %p1273_p4 = por %p1272_p10, %p1271_p2 }
 0x1a3   : > { %p1269_p0 = pneg %p1268_p9 }
 0x1a4   : > { %p1275_p13 = por %p1274_p8, %p1273_p4 }
 0x1a6   : > { %p1276_p3 = pnand %p1275_p13, %p1269_p0 }
 0x1a8   : > { %1279 = shalt.err (!%p1276_p3)
}
 0x1a9   : > { %1024 = dma.vmem_to_hbm [thread:$0]  (%p1539_p6), %s1728_s10, 1024, %s1722_s5, %s675_s12, %s1369_s6, %s1369_s6, %s1370_s11  }
 0x1aa PF: > { %s1853_s27 = sld [smem:[#allocation15_spill]]  ;;  %s1854_s29 = sld [smem:[#allocation16_spill]] }
 0x1ab   : > { %p1050_p7 = scmp.ge.s32.totalorder %s1358_s22, 2 }
 0x1b0   : > { %s723_s26 = sand.u32 1, %s1853_s27   ;;  %p1855_p12 = scmp.ne.s32.totalorder %s1854_s29, 0 }
 0x1b1   : > { %s724_s19 = scalar_lea.sflag [#allocation4], %s723_s26 }
 0x1b2   : > { %p1039_p11 = pnand %p1050_p7, %p1855_p12 }
 0x1b4   : > { %1321 = dma.done.wait (!%p1039_p11), %s724_s19, 1024  }
 0x1b5   : > { %1323 = vsyncadd (!%p1039_p11), %s724_s19, 4294966272  ;;  %s733_s8 = scalar_lea.sflag [#allocation10], %s723_s26 }
 0x1b6   : > { %1325 = dma.done.wait (!%p1039_p11), %s733_s8, 1024  }
 0x1b7   : > { %1327 = vsyncadd (!%p1039_p11), %s733_s8, 4294966272  ;;  %s25_s22 = sadd.s32 1, %s1358_s22   ;;  %s1856_s13 = sld [smem:[#allocation17_spill]] }
 0x1b8   : > { %p22_p1 = scmp.ge.s32.totalorder %s25_s22, 6   ;;  %s1857_s15 = smov %s1334_s16 }
 0x1b9   : > { %s1858_s16 = smov %s1338_s17  ;;  %s1859_s17 = smov %s1552_s1 }
 0x1ba   : > { %s1860_s18 = smov %s1350_s20  ;;  %s1861_s19 = smov %s1354_s21 }
 0x1bb   : > { %s1863_s21 = smov %s1869_s9  ;;  %24 = sbr.rel (!%p22_p1) target bundleno = 14 (0xe), region = 102 }
 0x1bd   : > { %s1862_s20 = smov %s1856_s13 }
 0x1c2   :  { %738 = vsyncpa [#allocation3], 1 }
 0x1c3   :  { %740 = vsyncpa [#allocation3 + $0x1], 1 }
 0x1c4   :  { %741 = vsyncpa [#allocation6], 1 }
 0x1c5   :  { %742 = vsyncpa [#allocation4], 1 }
 0x1c6   :  { %744 = vsyncpa [#allocation4 + $0x1], 1 }
 0x1c7   :  { %745 = vsyncpa [#allocation10], 1 }
 0x1c8   :  { %747 = vsyncpa [#allocation10 + $0x1], 1 }

</bundles_post_ra>
